<compile_context>
chip_gen: v7x
topology: tpu7x:2x2x1
jax: 0.10.0
libtpu: 0.0.40
codegen_flags: <defaults>
</compile_context>

<pallas_src>
import functools

import jax
import jax.numpy as jnp
from jax.experimental import pallas as pl
from jax.experimental.pallas import tpu as pltpu

KH = KW = 3  # 3x3 conv, padding=1, stride=1 (same spatial size)


def _shortcut_conv_kernel(x_ref, w_ref, b_ref, m_ref, o_ref, *, H, W):
    """One image (batch element) per grid step, NCHW layout.

    x_ref : (1, C, H*W)       bf16 activations (row-major flattened image)
    w_ref : (9, Cout, Cin)    bf16 per-tap weights, tap t = 3*(dy+1) + (dx+1)
    b_ref : (Cout, 1)         f32 bias
    m_ref : (2, H*W)          bf16 0/1 rows: [0] zero at col==W-1, [1] zero at col==0
    o_ref : (1, Cout, H*W)    f32 output = x + conv3x3(x) + bias
    """
    C = x_ref.shape[1]
    HW = H * W

    x = x_ref[0]                                   # (C, HW) bf16 — single activation read

    # Pre-mask x once per horizontal direction (broadcast (1,HW) mask over channels).
    keep_m1 = m_ref[0:1, :]                        # 0 where col == W-1 (source for dx = -1)
    keep_p1 = m_ref[1:2, :]                        # 0 where col == 0   (source for dx = +1)

    # Zero-extended flattened images (virtual rows -1 / H are zeros); the horizontal
    # wrap-around at row edges is already killed by the pre-masks above.
    zpad = jnp.zeros((C, W + 1), dtype=x.dtype)
    xp = {
        -1: jnp.concatenate([zpad, x * keep_m1, zpad], axis=1),   # (C, HW + 2W + 2) bf16
        0: jnp.concatenate([zpad, x, zpad], axis=1),
        1: jnp.concatenate([zpad, x * keep_p1, zpad], axis=1),
    }

    # Residual + bias, then accumulate the 9 taps (bf16 x bf16 -> f32 MXU accumulate).
    acc = x.astype(jnp.float32) + b_ref[...]       # (C, HW) f32
    t = 0
    for dy in (-1, 0, 1):
        for dx in (-1, 0, 1):
            start = (W + 1) + dy * W + dx
            tap = xp[dx][:, start:start + HW]      # (C, HW) bf16, pure static slice
            acc = acc + jnp.dot(w_ref[t], tap, preferred_element_type=jnp.float32)
            t += 1

    # TODO(synk): optionally store bf16 output (halves write traffic) if the model
    #             owner accepts the precision tradeoff.
    o_ref[0] = acc.astype(o_ref.dtype)             # lane-dense store (last dim = H*W)


@jax.jit
def shortcut_block(x_nchw, w_hwio, bias):
    """x_nchw: (N, C, H, W) f32.  Returns (N, C, H, W) f32 = x + conv3x3(x) + bias."""
    N, C, H, W = x_nchw.shape
    kh, kw, cin, cout = w_hwio.shape
    HW = H * W

    # Lane-dense NCHW view (free reshape) + bf16 for DMA / MXU.
    x_flat = x_nchw.reshape(N, C, HW).astype(jnp.bfloat16)

    # Per-tap weights: w_taps[t] = W[ky, kx]^T  (Cout, Cin), t = 3*ky + kx.
    w_taps = jnp.transpose(w_hwio, (0, 1, 3, 2)).reshape(kh * kw, cout, cin)
    w_taps = w_taps.astype(jnp.bfloat16)
    b_col = bias.reshape(cout, 1).astype(jnp.float32)

    # Tiny 0/1 edge-mask rows (bf16, resident; broadcast over channels in-kernel).
    col = jnp.arange(HW, dtype=jnp.int32) % W
    keep_m1 = (col != W - 1).astype(jnp.bfloat16)   # kill last column of the dx=-1 source
    keep_p1 = (col != 0).astype(jnp.bfloat16)       # kill first column of the dx=+1 source
    masks = jnp.stack([keep_m1, keep_p1], axis=0)   # (2, HW) bf16

    kernel = functools.partial(_shortcut_conv_kernel, H=H, W=W)
    flops = 2 * kh * kw * cin * cout * HW * N
    bytes_accessed = (N * C * HW * 2            # bf16 activations in
                      + N * cout * HW * 4       # f32 output
                      + kh * kw * cin * cout * 2 + cout * 4 + 2 * HW * 2)

    out_flat = pl.pallas_call(
        kernel,
        out_shape=jax.ShapeDtypeStruct((N, cout, HW), jnp.float32),
        grid_spec=pltpu.PrefetchScalarGridSpec(
            num_scalar_prefetch=0,
            grid=(N,),
            in_specs=[
                pl.BlockSpec((1, C, HW), lambda n: (n, 0, 0)),              # activations
                pl.BlockSpec((kh * kw, cout, cin), lambda n: (0, 0, 0)),    # weights (resident)
                pl.BlockSpec((cout, 1), lambda n: (0, 0)),                  # bias (resident)
                pl.BlockSpec((2, HW), lambda n: (0, 0)),                    # edge-mask rows (resident)
            ],
            out_specs=pl.BlockSpec((1, cout, HW), lambda n: (n, 0, 0)),
        ),
        compiler_params=pltpu.CompilerParams(
            dimension_semantics=("parallel",),
            # Above v5e's 16 MiB / v6e's 32 MiB default scoped limits, below v7x physical.
            vmem_limit_bytes=48 * 1024 * 1024,
        ),
        cost_estimate=pl.CostEstimate(
            flops=flops, transcendentals=0, bytes_accessed=bytes_accessed),
    )(x_flat, w_taps, b_col, masks)

    return out_flat.reshape(N, cout, H, W)


def reference(x_nchw, w_hwio, bias):
    # Pure-JAX reference: x + conv3x3(x) + bias in NCHW.
    w_oihw = jnp.transpose(w_hwio, (3, 2, 0, 1))
    conv = jax.lax.conv_general_dilated(
        x_nchw, w_oihw, window_strides=(1, 1), padding=((1, 1), (1, 1)),
        dimension_numbers=("NCHW", "OIHW", "NCHW"),
    )
    return x_nchw + conv + bias.reshape(1, -1, 1, 1)


if __name__ == "__main__":
    N, C, H, W = 2, 4, 16, 16
    key = jax.random.PRNGKey(0)
    kx_, kw_, kb_ = jax.random.split(key, 3)

    x = jax.random.normal(kx_, (N, C, H, W), dtype=jnp.float32)
    # Deterministic synthetic conv params (shapes from Conv2d(C, C, 3, padding=1)).
    w_hwio = jax.random.normal(kw_, (KH, KW, C, C), dtype=jnp.float32) * 0.1
    bias = jax.random.normal(kb_, (C,), dtype=jnp.float32) * 0.1

    out = jax.block_until_ready(shortcut_block(x, w_hwio, bias))

    # Reference at matching compute precision (kernel DMAs/multiplies bf16 inputs,
    # accumulates in f32), so quantize inputs the same way before the f32 reference.
    xq = x.astype(jnp.bfloat16).astype(jnp.float32)
    wq = w_hwio.astype(jnp.bfloat16).astype(jnp.float32)
    ref = jax.block_until_ready(reference(xq, wq, bias))

    assert out.shape == (N, C, H, W)
    assert jnp.allclose(out, ref, atol=1e-3, rtol=1e-3), float(jnp.max(jnp.abs(out - ref)))
    print("KERNEL_OK")
</pallas_src>

<mosaic_0001>
module attributes {stable_mosaic.version = 11 : i64} {
  func.func @_shortcut_conv_kernel(%arg0: i32, %arg1: memref<1x4x256xbf16, #tpu.memory_space<vmem>>, %arg2: memref<9x4x4xbf16, #tpu.memory_space<vmem>>, %arg3: memref<4x1xf32, #tpu.memory_space<vmem>>, %arg4: memref<2x256xbf16, #tpu.memory_space<vmem>>, %arg5: memref<1x4x256xf32, #tpu.memory_space<vmem>>) attributes {dimension_semantics = [#tpu.dimension_semantics<parallel>], iteration_bounds = array<i64: 2>, scalar_prefetch = 0 : i64, scratch_operands = 0 : i64, tpu.core_type = #tpu.core_type<tc>, window_params = [{transform_indices = @transform_0, window_bounds = array<i64: 1, 4, 256>}, {pipeline_mode = #tpu.pipeline_mode<synchronous>, transform_indices = @transform_1, window_bounds = array<i64: 9, 4, 4>}, {pipeline_mode = #tpu.pipeline_mode<synchronous>, transform_indices = @transform_2, window_bounds = array<i64: 4, 1>}, {pipeline_mode = #tpu.pipeline_mode<synchronous>, transform_indices = @transform_3, window_bounds = array<i64: 2, 256>}, {transform_indices = @transform_4, window_bounds = array<i64: 1, 4, 256>}]} {
    %c0 = arith.constant 0 : index
    %c0_0 = arith.constant 0 : index
    %c0_1 = arith.constant 0 : index
    %0 = vector.load %arg1[%c0, %c0_0, %c0_1] : memref<1x4x256xbf16, #tpu.memory_space<vmem>>, vector<1x4x256xbf16>
    %1 = vector.shape_cast %0 : vector<1x4x256xbf16> to vector<4x256xbf16>
    %c0_2 = arith.constant 0 : index
    %c0_3 = arith.constant 0 : index
    %2 = vector.load %arg4[%c0_2, %c0_3] : memref<2x256xbf16, #tpu.memory_space<vmem>>, vector<1x256xbf16>
    %c1 = arith.constant 1 : index
    %c0_4 = arith.constant 0 : index
    %3 = vector.load %arg4[%c1, %c0_4] : memref<2x256xbf16, #tpu.memory_space<vmem>>, vector<1x256xbf16>
    %cst = arith.constant 0.000000e+00 : bf16
    %4 = vector.broadcast %cst : bf16 to vector<4x17xbf16>
    %5 = vector.broadcast %2 : vector<1x256xbf16> to vector<4x256xbf16>
    %6 = arith.mulf %1, %5 : vector<4x256xbf16>
    %7 = tpu.concatenate %4, %6, %4 in 1 : vector<4x17xbf16>, vector<4x256xbf16>, vector<4x17xbf16> -> vector<4x290xbf16>
    %8 = tpu.concatenate %4, %1, %4 in 1 : vector<4x17xbf16>, vector<4x256xbf16>, vector<4x17xbf16> -> vector<4x290xbf16>
    %9 = vector.broadcast %3 : vector<1x256xbf16> to vector<4x256xbf16>
    %10 = arith.mulf %1, %9 : vector<4x256xbf16>
    %11 = tpu.concatenate %4, %10, %4 in 1 : vector<4x17xbf16>, vector<4x256xbf16>, vector<4x17xbf16> -> vector<4x290xbf16>
    %12 = arith.extf %1 : vector<4x256xbf16> to vector<4x256xf32>
    %c0_5 = arith.constant 0 : index
    %c0_6 = arith.constant 0 : index
    %13 = vector.load %arg3[%c0_5, %c0_6] : memref<4x1xf32, #tpu.memory_space<vmem>>, vector<4x1xf32>
    %14 = vector.broadcast %13 : vector<4x1xf32> to vector<4x256xf32>
    %15 = arith.addf %12, %14 : vector<4x256xf32>
    %16 = vector.extract_strided_slice %7 {offsets = [0, 0], sizes = [4, 256], strides = [1, 1]} : vector<4x290xbf16> to vector<4x256xbf16>
    %c0_7 = arith.constant 0 : index
    %c0_8 = arith.constant 0 : index
    %c0_9 = arith.constant 0 : index
    %17 = vector.load %arg2[%c0_7, %c0_8, %c0_9] : memref<9x4x4xbf16, #tpu.memory_space<vmem>>, vector<1x4x4xbf16>
    %18 = vector.shape_cast %17 : vector<1x4x4xbf16> to vector<4x4xbf16>
    %cst_10 = arith.constant dense<0.000000e+00> : vector<4x256xf32>
    %19 = tpu.matmul %18, %16, %cst_10 {dimension_numbers = #tpu.dot_dimension_numbers<[1], [0], [0], [1], [0, 0, 1, 1], [], []>} : vector<4x4xbf16>, vector<4x256xbf16>, vector<4x256xf32> -> vector<4x256xf32>
    %20 = arith.addf %15, %19 : vector<4x256xf32>
    %21 = vector.extract_strided_slice %8 {offsets = [0, 1], sizes = [4, 256], strides = [1, 1]} : vector<4x290xbf16> to vector<4x256xbf16>
    %c1_11 = arith.constant 1 : index
    %c0_12 = arith.constant 0 : index
    %c0_13 = arith.constant 0 : index
    %22 = vector.load %arg2[%c1_11, %c0_12, %c0_13] : memref<9x4x4xbf16, #tpu.memory_space<vmem>>, vector<1x4x4xbf16>
    %23 = vector.shape_cast %22 : vector<1x4x4xbf16> to vector<4x4xbf16>
    %cst_14 = arith.constant dense<0.000000e+00> : vector<4x256xf32>
    %24 = tpu.matmul %23, %21, %cst_14 {dimension_numbers = #tpu.dot_dimension_numbers<[1], [0], [0], [1], [0, 0, 1, 1], [], []>} : vector<4x4xbf16>, vector<4x256xbf16>, vector<4x256xf32> -> vector<4x256xf32>
    %25 = arith.addf %20, %24 : vector<4x256xf32>
    %26 = vector.extract_strided_slice %11 {offsets = [0, 2], sizes = [4, 256], strides = [1, 1]} : vector<4x290xbf16> to vector<4x256xbf16>
    %c2 = arith.constant 2 : index
    %c0_15 = arith.constant 0 : index
    %c0_16 = arith.constant 0 : index
    %27 = vector.load %arg2[%c2, %c0_15, %c0_16] : memref<9x4x4xbf16, #tpu.memory_space<vmem>>, vector<1x4x4xbf16>
    %28 = vector.shape_cast %27 : vector<1x4x4xbf16> to vector<4x4xbf16>
    %cst_17 = arith.constant dense<0.000000e+00> : vector<4x256xf32>
    %29 = tpu.matmul %28, %26, %cst_17 {dimension_numbers = #tpu.dot_dimension_numbers<[1], [0], [0], [1], [0, 0, 1, 1], [], []>} : vector<4x4xbf16>, vector<4x256xbf16>, vector<4x256xf32> -> vector<4x256xf32>
    %30 = arith.addf %25, %29 : vector<4x256xf32>
    %31 = vector.extract_strided_slice %7 {offsets = [0, 16], sizes = [4, 256], strides = [1, 1]} : vector<4x290xbf16> to vector<4x256xbf16>
    %c3 = arith.constant 3 : index
    %c0_18 = arith.constant 0 : index
    %c0_19 = arith.constant 0 : index
    %32 = vector.load %arg2[%c3, %c0_18, %c0_19] : memref<9x4x4xbf16, #tpu.memory_space<vmem>>, vector<1x4x4xbf16>
    %33 = vector.shape_cast %32 : vector<1x4x4xbf16> to vector<4x4xbf16>
    %cst_20 = arith.constant dense<0.000000e+00> : vector<4x256xf32>
    %34 = tpu.matmul %33, %31, %cst_20 {dimension_numbers = #tpu.dot_dimension_numbers<[1], [0], [0], [1], [0, 0, 1, 1], [], []>} : vector<4x4xbf16>, vector<4x256xbf16>, vector<4x256xf32> -> vector<4x256xf32>
    %35 = arith.addf %30, %34 : vector<4x256xf32>
    %36 = vector.extract_strided_slice %8 {offsets = [0, 17], sizes = [4, 256], strides = [1, 1]} : vector<4x290xbf16> to vector<4x256xbf16>
    %c4 = arith.constant 4 : index
    %c0_21 = arith.constant 0 : index
    %c0_22 = arith.constant 0 : index
    %37 = vector.load %arg2[%c4, %c0_21, %c0_22] : memref<9x4x4xbf16, #tpu.memory_space<vmem>>, vector<1x4x4xbf16>
    %38 = vector.shape_cast %37 : vector<1x4x4xbf16> to vector<4x4xbf16>
    %cst_23 = arith.constant dense<0.000000e+00> : vector<4x256xf32>
    %39 = tpu.matmul %38, %36, %cst_23 {dimension_numbers = #tpu.dot_dimension_numbers<[1], [0], [0], [1], [0, 0, 1, 1], [], []>} : vector<4x4xbf16>, vector<4x256xbf16>, vector<4x256xf32> -> vector<4x256xf32>
    %40 = arith.addf %35, %39 : vector<4x256xf32>
    %41 = vector.extract_strided_slice %11 {offsets = [0, 18], sizes = [4, 256], strides = [1, 1]} : vector<4x290xbf16> to vector<4x256xbf16>
    %c5 = arith.constant 5 : index
    %c0_24 = arith.constant 0 : index
    %c0_25 = arith.constant 0 : index
    %42 = vector.load %arg2[%c5, %c0_24, %c0_25] : memref<9x4x4xbf16, #tpu.memory_space<vmem>>, vector<1x4x4xbf16>
    %43 = vector.shape_cast %42 : vector<1x4x4xbf16> to vector<4x4xbf16>
    %cst_26 = arith.constant dense<0.000000e+00> : vector<4x256xf32>
    %44 = tpu.matmul %43, %41, %cst_26 {dimension_numbers = #tpu.dot_dimension_numbers<[1], [0], [0], [1], [0, 0, 1, 1], [], []>} : vector<4x4xbf16>, vector<4x256xbf16>, vector<4x256xf32> -> vector<4x256xf32>
    %45 = arith.addf %40, %44 : vector<4x256xf32>
    %46 = vector.extract_strided_slice %7 {offsets = [0, 32], sizes = [4, 256], strides = [1, 1]} : vector<4x290xbf16> to vector<4x256xbf16>
    %c6 = arith.constant 6 : index
    %c0_27 = arith.constant 0 : index
    %c0_28 = arith.constant 0 : index
    %47 = vector.load %arg2[%c6, %c0_27, %c0_28] : memref<9x4x4xbf16, #tpu.memory_space<vmem>>, vector<1x4x4xbf16>
    %48 = vector.shape_cast %47 : vector<1x4x4xbf16> to vector<4x4xbf16>
    %cst_29 = arith.constant dense<0.000000e+00> : vector<4x256xf32>
    %49 = tpu.matmul %48, %46, %cst_29 {dimension_numbers = #tpu.dot_dimension_numbers<[1], [0], [0], [1], [0, 0, 1, 1], [], []>} : vector<4x4xbf16>, vector<4x256xbf16>, vector<4x256xf32> -> vector<4x256xf32>
    %50 = arith.addf %45, %49 : vector<4x256xf32>
    %51 = vector.extract_strided_slice %8 {offsets = [0, 33], sizes = [4, 256], strides = [1, 1]} : vector<4x290xbf16> to vector<4x256xbf16>
    %c7 = arith.constant 7 : index
    %c0_30 = arith.constant 0 : index
    %c0_31 = arith.constant 0 : index
    %52 = vector.load %arg2[%c7, %c0_30, %c0_31] : memref<9x4x4xbf16, #tpu.memory_space<vmem>>, vector<1x4x4xbf16>
    %53 = vector.shape_cast %52 : vector<1x4x4xbf16> to vector<4x4xbf16>
    %cst_32 = arith.constant dense<0.000000e+00> : vector<4x256xf32>
    %54 = tpu.matmul %53, %51, %cst_32 {dimension_numbers = #tpu.dot_dimension_numbers<[1], [0], [0], [1], [0, 0, 1, 1], [], []>} : vector<4x4xbf16>, vector<4x256xbf16>, vector<4x256xf32> -> vector<4x256xf32>
    %55 = arith.addf %50, %54 : vector<4x256xf32>
    %56 = vector.extract_strided_slice %11 {offsets = [0, 34], sizes = [4, 256], strides = [1, 1]} : vector<4x290xbf16> to vector<4x256xbf16>
    %c8 = arith.constant 8 : index
    %c0_33 = arith.constant 0 : index
    %c0_34 = arith.constant 0 : index
    %57 = vector.load %arg2[%c8, %c0_33, %c0_34] : memref<9x4x4xbf16, #tpu.memory_space<vmem>>, vector<1x4x4xbf16>
    %58 = vector.shape_cast %57 : vector<1x4x4xbf16> to vector<4x4xbf16>
    %cst_35 = arith.constant dense<0.000000e+00> : vector<4x256xf32>
    %59 = tpu.matmul %58, %56, %cst_35 {dimension_numbers = #tpu.dot_dimension_numbers<[1], [0], [0], [1], [0, 0, 1, 1], [], []>} : vector<4x4xbf16>, vector<4x256xbf16>, vector<4x256xf32> -> vector<4x256xf32>
    %60 = arith.addf %55, %59 : vector<4x256xf32>
    %c0_36 = arith.constant 0 : index
    %c0_37 = arith.constant 0 : index
    %c0_38 = arith.constant 0 : index
    %61 = vector.load %arg5[%c0_36, %c0_37, %c0_38] : memref<1x4x256xf32, #tpu.memory_space<vmem>>, vector<1x4x256xf32>
    %62 = vector.shape_cast %61 : vector<1x4x256xf32> to vector<4x256xf32>
    %63 = vector.shape_cast %60 : vector<4x256xf32> to vector<1x4x256xf32>
    tpu.vector_store %arg5[%c0_36, %c0_37, %c0_38], %63 {strides = array<i32>} : memref<1x4x256xf32, #tpu.memory_space<vmem>>, vector<1x4x256xf32>,
    return
  }
  func.func @transform_0(%arg0: i32) -> (i32, i32, i32) {
    %c0_i32 = arith.constant 0 : i32
    %c0_i32_0 = arith.constant 0 : i32
    %c0_i32_1 = arith.constant 0 : i32
    return %arg0, %c0_i32, %c0_i32_0 : i32, i32, i32
  }
  func.func @transform_1(%arg0: i32) -> (i32, i32, i32) {
    %c0_i32 = arith.constant 0 : i32
    %c0_i32_0 = arith.constant 0 : i32
    %c0_i32_1 = arith.constant 0 : i32
    %c0_i32_2 = arith.constant 0 : i32
    return %c0_i32, %c0_i32_0, %c0_i32_1 : i32, i32, i32
  }
  func.func @transform_2(%arg0: i32) -> (i32, i32) {
    %c0_i32 = arith.constant 0 : i32
    %c0_i32_0 = arith.constant 0 : i32
    %c0_i32_1 = arith.constant 0 : i32
    return %c0_i32, %c0_i32_0 : i32, i32
  }
  func.func @transform_3(%arg0: i32) -> (i32, i32) {
    %c0_i32 = arith.constant 0 : i32
    %c0_i32_0 = arith.constant 0 : i32
    %c0_i32_1 = arith.constant 0 : i32
    return %c0_i32, %c0_i32_0 : i32, i32
  }
  func.func @transform_4(%arg0: i32) -> (i32, i32, i32) {
    %c0_i32 = arith.constant 0 : i32
    %c0_i32_0 = arith.constant 0 : i32
    %c0_i32_1 = arith.constant 0 : i32
    return %arg0, %c0_i32, %c0_i32_0 : i32, i32, i32
  }
}

</mosaic_0001>

<bundles_post_ra>
// kernel: shortcut_block.1
= control target key start
LH: loop header
LB: loop body
LE: loop exit
PB: predicated region body
PF: predicated region fallthrough
CT: control target
= control target key end

     0   :  { %s1103_s15 = smov 0   ;;  %s1215_s0 = inlined_call_operand.vmem [shape: bf16[2,4,256], index: 0, kind: input, shape index: {}]   ;;  %s1216_s1 = inlined_call_operand.vmem [shape: bf16[9,4,4], index: 1, kind: input, shape index: {}]   ;;  %s1217_s2 = inlined_call_operand.vmem [shape: f32[4,1], index: 2, kind: input, shape index: {}]   ;;  %s1218_s3 = inlined_call_operand.vmem [shape: bf16[2,256], index: 3, kind: input, shape index: {}]   ;;  %s1219_s4 = inlined_call_operand.vmem [shape: f32[2,4,256], index: 4, kind: output, shape index: {}]  }
   0x1 LB: > { %s995_s16 = sadd.s32 4294967295, %s1063_s15   ;;  %p999_p0 = scmp.ge.s32.totalorder %s1063_s15, 1  ;;  %s1063_s15 = sphi %s1103_s15, %s14_s15  }
   0x2   : > { %p162_p1 = scmp.lt.s32.totalorder %s1063_s15, 3 }
   0x4   : > { %p163_p2 = pnand %p999_p0, %p162_p1 }
   0x5   : > { %p188_p3 = scmp.lt.s32.totalorder (!%p163_p2), %s995_s16, 1  ;;  %v213_v0 = vlaneseq (!%p163_p2)  ;;  %v1065_v1 = vmov (!%p163_p2), 1983009808   ;;  %v1066_v4 = vmov (!%p163_p2), 1966171168   ;;  %s1067_s23 = smov (!%p163_p2), 17  }
   0x6   : > { %166 = sbr.rel (%p163_p2) target bundleno = 518 (0x206), region = 36  ;;  %v242_v2 = vunpack.c.l.s4 (!%p163_p2), %v1065_v1  ;;  %v1004_v3 = vld.sshfl [vmem:[%s1218_s3] sm:$0x11 pattern:$0x75316420] (!%p163_p2)  ;;  %v211_v5 = vunpack.c.l.s4 (!%p163_p2), %v1066_v4  ;;  %vm263_vm0 = vcmask (!%p163_p2), 138240  }
   0x7   : > { %v1116_v6 = vshrl.u32 (!%p163_p2), %v213_v0, 7  ;;  %v209_v8 = vcombine.high (!%p163_p2), %v1004_v3, %v1004_v3  ;;  %s1068_s24 = smov (!%p163_p2), 127   ;;  %s1069_s25 = smov (!%p163_p2), 111   ;;  %v1070_v43 = vmov (!%p163_p2), 0   ;;  %vm353_vm1 = vcmask (!%p163_p2), 1041408  }
   0x8   : > { %v243_v7 = vunpack.c.0.s8 (!%p163_p2), %v242_v2  ;;  %v212_v9 = vunpack.c.0.s8 (!%p163_p2), %v211_v5  ;;  %391 = vmatprep.mubr.bf16.mxu0 (!%p163_p2), %v1070_v43  ;;  %459 = vmatprep.mubr.bf16.mxu1 (!%p163_p2), %v1070_v43  ;;  %s1071_s26 = smov (!%p163_p2), 112   ;;  %s1072_s27 = smov (!%p163_p2), 126   ;;  %v348_v53 = vld [vmem:[%s1216_s1] sm:$0x3] (!%p163_p2)  ;;  %vm349_vm2 = vcmask (!%p163_p2), 31744   ;;  %vm415_vm3 = vcmask (!%p163_p2), 1039360  }
   0x9   : > { %v229_v16 = vsub.s32 (!%p163_p2), 0, %v1116_v6  ;;  %1056 = vset.pattern.permute.xlu0 (!%p163_p2), %v1070_v43  ;;  %s1073_s30 = smov (!%p163_p2), 110   ;;  %s1074_s5 = smov (!%p163_p2), 96   ;;  %v334_v56 = vld [vmem:[%s1217_s2] sm:$0xf] (!%p163_p2)  ;;  %vm551_vm4 = vcmask (!%p163_p2), 916480  }
   0xa   : > { %v246_v10 = vsub.s32 (!%p163_p2), %v243_v7, %v1116_v6  ;;  %v215_v11 = vsub.s32 (!%p163_p2), %v212_v9, %v1116_v6  ;;  %s1075_s6 = smov (!%p163_p2), 95   ;;  %s1076_s7 = smov (!%p163_p2), 94   ;;  %v1007_v0 = vld [vmem:[%s1216_s1 + $0x2] sm:$0x3] (!%p163_p2)  ;;  %vm483_vm5 = vcmask (!%p163_p2), 1031168   ;;  %vm617_vm6 = vcmask (!%p163_p2), 908288  }
   0xb   : > { %vm749_vm7 = vcmask (!%p163_p2), 785408   ;;  %vm683_vm8 = vcmask (!%p163_p2), 900096   ;;  %vm815_vm9 = vcmask (!%p163_p2), 777216   ;;  %vm881_vm10 = vcmask (!%p163_p2), 769024  }
   0xc   : > { %v216_v14 = vrot.slane (!%p163_p2), %v1004_v3, %v215_v11  ;;  %v223_v15 = vrot.slane (!%p163_p2), %v209_v8, %v215_v11  ;;  %v1013_v11 = vld [vmem:[%s1216_s1 + $0x6] sm:$0x3] (!%p163_p2) }
   0xd   : > { %s1221_s16 = smov (!%p188_p3, %s995_s16), 1 }
   0xe   : > { %s1033_s19 = sshll.u32 %s1221_s16, 2  ;;  %v289_v18 = vshrl.u32 %v216_v14, 16  ;;  %v296_v19 = vshrl.u32 %v223_v15, 16  ;;  %v225_v20 = vpack.i.b16 %v216_v14, %v216_v14  ;;  %v232_v21 = vpack.i.b16 %v223_v15, %v223_v15  ;;  %s1034_s28 = sshll.u32 %s1221_s16, 3 }
   0xf   : > { %s192_s22 = scalar_lea.vmem %s1215_s0, %s1033_s19 }
  0x10   : > { %v1124_v12 = vld [vmem:[%s192_s22] sm:$0xf]  ;;  %v290_v22 = vpack.i.b16 %v289_v18, %v289_v18  ;;  %v297_v23 = vpack.i.b16 %v296_v19, %v296_v19  ;;  %v230_v24 = vrot.slane %v225_v20, %v229_v16  ;;  %v237_v25 = vrot.slane %v232_v21, %v229_v16  ;;  %v1010_v20 = vld [vmem:[%s1216_s1 + $0x4] sm:$0x3] }
  0x11   : > { %v278_v13 = vrot.slane %v1124_v12, %v246_v10 }
  0x12   : > { %v295_v26 = vrot.slane %v290_v22, %v229_v16  ;;  %v302_v27 = vrot.slane %v297_v23, %v229_v16  ;;  %v240_v28 = vcombine.low %v230_v24, %v237_v25 }
  0x13   : > { %280 = vrot.lane.b32.xlu0 %v278_v13, %s1067_s23  ;;  %v279_v17 = vcombine.high %v278_v13, %v278_v13 }
  0x14   : > { %v305_v29 = vcombine.low %v295_v26, %v302_v27  ;;  %v247_v30 = vrot.slane %v240_v28, %v246_v10  ;;  %v1016_v28 = vld [vmem:[%s1216_s1 + $0x8] sm:$0x3] }
  0x16   : > { %v312_v31 = vrot.slane %v305_v29, %v246_v10  ;;  %v249_v32 = vmul.bf16 %v247_v30, %v1124_v12 }
  0x17   : > { %282 = vrot.lane.b32.xlu0 %v279_v17, %s1067_s23 }
  0x18   : > { %v314_v33 = vmul.bf16 %v312_v31, %v1124_v12  ;;  %v257_v34 = vrot.slane %v249_v32, %v246_v10 }
  0x1a   : > { %v322_v35 = vrot.slane %v314_v33, %v246_v10  ;;  %v258_v37 = vcombine.high %v257_v34, %v257_v34 }
  0x1b   : > { %259 = vrot.lane.b32.xlu0 %v257_v34, %s1067_s23 }
  0x1c   : > { %324 = vrot.lane.b32.xlu1 %v322_v35, %s1067_s23  ;;  %v323_v36 = vcombine.high %v322_v35, %v322_v35  ;;  %v1019_v35 = vld [vmem:[%s1216_s1 + $0xa] sm:$0x3] }
  0x20   : > { %326 = vrot.lane.b32.xlu1 %v323_v36, %s1067_s23 }
  0x24   : > { %261 = vrot.lane.b32.xlu1 %v258_v37, %s1067_s23 }
  0x85   : > { %v281_v38 = vpop.permute.xlu0 %280 }
  0x86   : > { %v286_v39 = vsel %vm263_vm0, 0, %v281_v38 }
  0x87   : > { %409 = vrot.lane.b32.xlu0 %v286_v39, %s1068_s24  ;;  %611 = vrot.lane.b32.xlu1 %v286_v39, %s1069_s25 }
  0x89   : > { %v283_v40 = vpop.permute.xlu0 %282 }
  0x8a   : > { %v288_v41 = vsel %vm263_vm0, %v283_v40, 0  ;;  %v284_v42 = vsel %vm263_vm0, %v281_v38, %v283_v40 }
  0x8b   : > { %413 = vrot.lane.b32.xlu0 %v288_v41, %s1068_s24  ;;  %411 = vrot.lane.b32.xlu1 %v284_v42, %s1068_s24 }
  0x8d   : > { %v260_v44 = vpop.permute.xlu0 %259 }
  0x8e   : > { %v325_v45 = vpop.permute.xlu1 %324  ;;  %v268_v46 = vsel %vm263_vm0, 0, %v260_v44 }
  0x8f   : > { %613 = vrot.lane.b32.xlu0 %v284_v42, %s1069_s25  ;;  %615 = vrot.lane.b32.xlu1 %v288_v41, %s1069_s25  ;;  %v330_v47 = vsel %vm263_vm0, 0, %v325_v45  ;;  %v354_v52 = vsel %vm353_vm1, %v268_v46, 0 }
  0x92   : > { %v327_v48 = vpop.permute.xlu1 %326 }
  0x93   : > { %545 = vrot.lane.b32.xlu0 %v268_v46, %s1071_s26  ;;  %477 = vrot.lane.b32.xlu1 %v330_v47, %s1072_s27  ;;  %v328_v54 = vsel %vm263_vm0, %v325_v45, %v327_v48  ;;  %v332_v55 = vsel %vm263_vm0, %v327_v48, 0  ;;  %v1025_v45 = vld [vmem:[%s1216_s1 + $0xe] sm:$0x3] }
  0x96   : > { %v262_v49 = vpop.permute.xlu1 %261 }
  0x97   : > { %v270_v50 = vsel %vm263_vm0, %v262_v49, 0  ;;  %v264_v51 = vsel %vm263_vm0, %v260_v44, %v262_v49 }
  0x98   : > { %549 = vrot.lane.b32.xlu0 %v270_v50, %s1071_s26  ;;  %547 = vrot.lane.b32.xlu1 %v264_v51, %s1071_s26 }
  0x99   : > { %1005 = vmatprep.subr.msk.bf16.mxu0 %vm353_vm1, %v264_v51 }
  0x9a   : > { %360 = vmatpush1.bf16.msra.mxu0 %v354_v52 }
  0x9c   : > { %479 = vrot.lane.b32.xlu0 %v328_v54, %s1072_s27  ;;  %481 = vrot.lane.b32.xlu1 %v332_v55, %s1072_s27 }
  0x9d   : > { %1006 = vmatmul.mubr.msk.bf16.vlgmr.msra.gmra.mrb[0].mxu0 %vm349_vm2, %v348_v53 }
  0x9e   : > { %527 = vmatprep.mubr.bf16.mxu0 %v1070_v43 }
  0xa0   : > { %677 = vrot.lane.b32.xlu0 %v330_v47, %s1073_s30  ;;  %743 = vrot.lane.b32.xlu1 %v268_v46, %s1074_s5 }
  0xa4   : > { %745 = vrot.lane.b32.xlu0 %v264_v51, %s1074_s5  ;;  %747 = vrot.lane.b32.xlu1 %v270_v50, %s1074_s5  ;;  %v1028_v51 = vld [vmem:[%s1216_s1 + $0x10] sm:$0x3]  ;;  %s197_s5 = scalar_lea.vmem %s1219_s4, %s1034_s28 }
  0xa8   : > { %681 = vrot.lane.b32.xlu0 %v332_v55, %s1073_s30  ;;  %679 = vrot.lane.b32.xlu1 %v328_v54, %s1073_s30 }
  0xac   : > { %809 = vrot.lane.b32.xlu0 %v286_v39, %s1075_s6  ;;  %811 = vrot.lane.b32.xlu1 %v284_v42, %s1075_s6  ;;  %v1022_v39 = vld [vmem:[%s1216_s1 + $0xc] sm:$0x3] }
  0xb0   : > { %813 = vrot.lane.b32.xlu0 %v288_v41, %s1075_s6  ;;  %875 = vrot.lane.b32.xlu1 %v330_v47, %s1076_s7 }
  0xb4   : > { %877 = vrot.lane.b32.xlu0 %v328_v54, %s1076_s7  ;;  %879 = vrot.lane.b32.xlu1 %v332_v55, %s1076_s7 }
  0xb8   : > { %337 = vperm.xlu0 %1056, %v334_v56   ;;  %v1077_v56 = vmov 839922192  }
  0xf9   : > { %v410_v57 = vpop.permute.xlu0 %409  ;;  %v612_v58 = vpop.permute.xlu1 %611 }
  0xfd   : > { %v414_v59 = vpop.permute.xlu0 %413  ;;  %v412_v60 = vpop.permute.xlu1 %411 }
  0xfe   : > { %v417_v61 = vsel %vm415_vm3, %v412_v60, %v414_v59  ;;  %v416_v62 = vsel %vm415_vm3, %v410_v57, %v412_v60  ;;  %v340_v57 = vunpack.c.l.s4 %v1077_v56 }
  0xff   : > { %1008 = vmatprep.subr.msk.bf16.mxu1 %vm353_vm1, %v417_v61  ;;  %v422_v63 = vsel %vm353_vm1, %v416_v62, 0  ;;  %v333_v61 = vunpack.c.l.bf16 %v1124_v12 }
 0x100   : > { %428 = vmatpush1.bf16.msra.mxu1 %v422_v63 }
 0x101   : > { %v614_v1 = vpop.permute.xlu0 %613  ;;  %v616_v2 = vpop.permute.xlu1 %615 }
 0x102   : > { %v618_v18 = vsel %vm617_vm6, %v612_v58, %v614_v1  ;;  %v619_v19 = vsel %vm617_vm6, %v614_v1, %v616_v2  ;;  %v341_v58 = vunpack.c.0.s8 %v340_v57 }
 0x103   : > { %1009 = vmatmul.mubr.msk.bf16.vlgmr.msra.gmra.mrb[0].mxu1 %vm349_vm2, %v1007_v0  ;;  %v624_v23 = vsel %vm353_vm1, %v618_v18, 0 }
 0x104   : > { %595 = vmatprep.mubr.bf16.mxu1 %v1070_v43  ;;  %v344_v59 = vsub.s32 %v341_v58, %v1116_v6 }
 0x105   : > { %v546_v3 = vpop.permute.xlu0 %545  ;;  %v478_v4 = vpop.permute.xlu1 %477 }
 0x10a   : > { %v550_v5 = vpop.permute.xlu0 %549  ;;  %v548_v7 = vpop.permute.xlu1 %547 }
 0x10b   : > { %v552_v8 = vsel %vm551_vm4, %v546_v3, %v548_v7  ;;  %v553_v9 = vsel %vm551_vm4, %v548_v7, %v550_v5 }
 0x10c   : > { %v558_v10 = vsel %vm353_vm1, %v552_v8, 0  ;;  %1014 = vmatprep.subr.msk.bf16.mxu1 %vm353_vm1, %v553_v9 }
 0x10d   : > { %564 = vmatpush1.bf16.msra.mxu1 %v558_v10 }
 0x10e   : > { %v480_v13 = vpop.permute.xlu0 %479  ;;  %v482_v14 = vpop.permute.xlu1 %481 }
 0x10f   : > { %v484_v15 = vsel %vm483_vm5, %v478_v4, %v480_v13  ;;  %v485_v16 = vsel %vm483_vm5, %v480_v13, %v482_v14 }
 0x110   : > { %v490_v17 = vsel %vm353_vm1, %v484_v15, 0  ;;  %1011 = vmatprep.subr.msk.bf16.mxu0 %vm353_vm1, %v485_v16  ;;  %1015 = vmatmul.mubr.msk.bf16.vlgmr.msra.gmra.mrb[4].mxu1 %vm349_vm2, %v1013_v11 }
 0x111   : > { %496 = vmatpush1.bf16.msra.mxu0 %v490_v17  ;;  %727 = vmatprep.mubr.bf16.mxu1 %v1070_v43 }
 0x112   : > { %v678_v21 = vpop.permute.xlu0 %677  ;;  %1017 = vmatprep.subr.msk.bf16.mxu0 %vm353_vm1, %v619_v19  ;;  %v744_v22 = vpop.permute.xlu1 %743 }
 0x114   : > { %1012 = vmatmul.mubr.msk.bf16.vlgmr.msra.gmra.mrb[4].mxu0 %vm349_vm2, %v1010_v20 }
 0x115   : > { %630 = vmatpush1.bf16.msra.mxu0 %v624_v23  ;;  %661 = vmatprep.mubr.bf16.mxu0 %v1070_v43 }
 0x116   : > { %v746_v24 = vpop.permute.xlu0 %745  ;;  %v748_v25 = vpop.permute.xlu1 %747 }
 0x117   : > { %v751_v26 = vsel %vm749_vm7, %v746_v24, %v748_v25  ;;  %v750_v27 = vsel %vm749_vm7, %v744_v22, %v746_v24 }
 0x118   : > { %1023 = vmatprep.subr.msk.bf16.mxu0 %vm353_vm1, %v751_v26  ;;  %v756_v33 = vsel %vm353_vm1, %v750_v27, 0 }
 0x11a   : > { %v682_v29 = vpop.permute.xlu0 %681  ;;  %v680_v30 = vpop.permute.xlu1 %679 }
 0x11b   : > { %v684_v31 = vsel %vm683_vm8, %v678_v21, %v680_v30  ;;  %v685_v32 = vsel %vm683_vm8, %v680_v30, %v682_v29 }
 0x11c   : > { %v690_v34 = vsel %vm353_vm1, %v684_v31, 0  ;;  %1018 = vmatmul.mubr.msk.bf16.vlgmr.msra.gmra.mrb[8].mxu0 %vm349_vm2, %v1016_v28  ;;  %1020 = vmatprep.subr.msk.bf16.mxu1 %vm353_vm1, %v685_v32 }
 0x11d   : > { %762 = vmatpush1.bf16.msra.mxu0 %v756_v33  ;;  %696 = vmatpush1.bf16.msra.mxu1 %v690_v34 }
 0x11e   : > { %v810_v36 = vpop.permute.xlu0 %809  ;;  %v812_v37 = vpop.permute.xlu1 %811  ;;  %793 = vmatprep.mubr.bf16.mxu0 %v1070_v43 }
 0x11f   : > { %v816_v38 = vsel %vm815_vm9, %v810_v36, %v812_v37 }
 0x120   : > { %1021 = vmatmul.mubr.msk.bf16.vlgmr.msra.gmra.mrb[8].mxu1 %vm349_vm2, %v1019_v35  ;;  %v822_v44 = vsel %vm353_vm1, %v816_v38, 0 }
 0x121   : > { %859 = vmatprep.mubr.bf16.mxu1 %v1070_v43 }
 0x122   : > { %v814_v40 = vpop.permute.xlu0 %813  ;;  %v876_v41 = vpop.permute.xlu1 %875 }
 0x123   : > { %v817_v42 = vsel %vm815_vm9, %v812_v37, %v814_v40 }
 0x124   : > { %1024 = vmatmul.mubr.msk.bf16.vlgmr.msra.gmra.mrb[12].mxu0 %vm349_vm2, %v1022_v39  ;;  %1026 = vmatprep.subr.msk.bf16.mxu1 %vm353_vm1, %v817_v42 }
 0x125   : > { %828 = vmatpush1.bf16.msra.mxu1 %v822_v44  ;;  %925 = vmatprep.mubr.bf16.mxu0 %v1070_v43 }
 0x126   : > { %v878_v46 = vpop.permute.xlu0 %877  ;;  %v880_v47 = vpop.permute.xlu1 %879 }
 0x127   : > { %v882_v48 = vsel %vm881_vm10, %v876_v41, %v878_v46  ;;  %v883_v49 = vsel %vm881_vm10, %v878_v46, %v880_v47 }
 0x128   : > { %v888_v50 = vsel %vm353_vm1, %v882_v48, 0  ;;  %1027 = vmatmul.mubr.msk.bf16.vlgmr.msra.gmra.mrb[12].mxu1 %vm349_vm2, %v1025_v45  ;;  %1029 = vmatprep.subr.msk.bf16.mxu0 %vm353_vm1, %v883_v49 }
 0x129   : > { %894 = vmatpush1.bf16.msra.mxu0 %v888_v50 }
 0x12c   : > { %1030 = vmatmul.mubr.msk.bf16.vlgmr.msra.gmra.mrb[16].mxu0 %vm349_vm2, %v1028_v51 }
 0x137   : > { %v338_v60 = vpop.permute.xlu0 %337 }
 0x138   : > { %v345_v62 = vrot.slane %v338_v60, %v344_v59 }
 0x13a   : > { %v347_v63 = vadd.f32 %v345_v62, %v333_v61 }
 0x170   : > { %v393_v52 = vpop.f32.mrb[0].mxu0 }
 0x171   : > { %v395_v53 = vpop.f32.mrb[1].mxu0 }
 0x172   : > { %v402_v43 = vcombine.low %v393_v52, %v395_v53  ;;  %v397_v54 = vpop.f32.mrb[2].mxu0 }
 0x173   : > { %v398_v55 = vpop.f32.mrb[3].mxu0 }
 0x174   : > { %v404_v0 = vadd.f32 %v402_v43, %v347_v63 }
 0x1d6   : > { %v461_v1 = vpop.f32.mrb[0].mxu1 }
 0x1d7   : > { %v463_v2 = vpop.f32.mrb[1].mxu1 }
 0x1d8   : > { %v470_v3 = vcombine.low %v461_v1, %v463_v2  ;;  %v465_v4 = vpop.f32.mrb[2].mxu1 }
 0x1d9   : > { %v466_v5 = vpop.f32.mrb[3].mxu1 }
 0x1da   : > { %v472_v7 = vadd.f32 %v470_v3, %v404_v0 }
 0x1e3   : > { %v597_v8 = vpop.f32.mrb[4].mxu1 }
 0x1e4   : > { %v599_v9 = vpop.f32.mrb[5].mxu1 }
 0x1e5   : > { %v606_v10 = vcombine.low %v597_v8, %v599_v9  ;;  %v601_v11 = vpop.f32.mrb[6].mxu1 }
 0x1e6   : > { %v602_v13 = vpop.f32.mrb[7].mxu1 }
 0x1e7   : > { %v529_v14 = vpop.f32.mrb[4].mxu0 }
 0x1e8   : > { %v531_v15 = vpop.f32.mrb[5].mxu0 }
 0x1e9   : > { %v538_v6 = vcombine.low %v529_v14, %v531_v15  ;;  %v533_v16 = vpop.f32.mrb[6].mxu0 }
 0x1ea   : > { %v534_v17 = vpop.f32.mrb[7].mxu0 }
 0x1eb   : > { %v540_v12 = vadd.f32 %v538_v6, %v472_v7 }
 0x1ed   : > { %v608_v18 = vadd.f32 %v606_v10, %v540_v12 }
 0x1ef   : > { %v663_v19 = vpop.f32.mrb[8].mxu0 }
 0x1f0   : > { %v665_v20 = vpop.f32.mrb[9].mxu0 }
 0x1f1   : > { %v672_v21 = vcombine.low %v663_v19, %v665_v20  ;;  %v667_v22 = vpop.f32.mrb[10].mxu0 }
 0x1f2   : > { %v668_v23 = vpop.f32.mrb[11].mxu0 }
 0x1f3   : > { %v674_v24 = vadd.f32 %v672_v21, %v608_v18  ;;  %v729_v25 = vpop.f32.mrb[8].mxu1 }
 0x1f4   : > { %v731_v26 = vpop.f32.mrb[9].mxu1 }
 0x1f5   : > { %v738_v27 = vcombine.low %v729_v25, %v731_v26  ;;  %v733_v28 = vpop.f32.mrb[10].mxu1 }
 0x1f6   : > { %v734_v29 = vpop.f32.mrb[11].mxu1 }
 0x1f7   : > { %v740_v30 = vadd.f32 %v738_v27, %v674_v24  ;;  %v795_v31 = vpop.f32.mrb[12].mxu0 }
 0x1f8   : > { %v797_v32 = vpop.f32.mrb[13].mxu0 }
 0x1f9   : > { %v804_v33 = vcombine.low %v795_v31, %v797_v32  ;;  %v799_v34 = vpop.f32.mrb[14].mxu0 }
 0x1fa   : > { %v800_v35 = vpop.f32.mrb[15].mxu0 }
 0x1fb   : > { %v806_v36 = vadd.f32 %v804_v33, %v740_v30  ;;  %v861_v37 = vpop.f32.mrb[12].mxu1 }
 0x1fc   : > { %v863_v38 = vpop.f32.mrb[13].mxu1 }
 0x1fd   : > { %v870_v39 = vcombine.low %v861_v37, %v863_v38  ;;  %v865_v40 = vpop.f32.mrb[14].mxu1 }
 0x1fe   : > { %v866_v41 = vpop.f32.mrb[15].mxu1 }
 0x1ff   : > { %v872_v42 = vadd.f32 %v870_v39, %v806_v36  ;;  %v927_v44 = vpop.f32.mrb[16].mxu0 }
 0x200   : > { %v929_v45 = vpop.f32.mrb[17].mxu0 }
 0x201   : > { %v936_v46 = vcombine.low %v927_v44, %v929_v45  ;;  %v931_v47 = vpop.f32.mrb[18].mxu0 }
 0x202   : > { %v932_v48 = vpop.f32.mrb[19].mxu0 }
 0x203   : > { %v938_v49 = vadd.f32 %v936_v46, %v872_v42 }
 0x205   : > { %939 = vst [vmem:[%s197_s5] sm:$0xff] %v938_v49 }
 0x206 PF: > { %s14_s15 = sadd.s32 1, %s1063_s15  }
 0x207   : > { %p11_p4 = scmp.ge.s32.totalorder %s14_s15, 4  }
 0x209   :  { %13 = sbr.rel (!%p11_p4) target bundleno = 1 (0x1), region = 74 }

</bundles_post_ra>
